<compile_context>
chip_gen: v5e
topology: v5e:2x2
jax: 0.10.0
libtpu: 0.0.40
codegen_flags: <defaults>
</compile_context>

<pallas_src>
import math

import jax
import jax.numpy as jnp
from jax.experimental import pallas as pl
from jax.experimental.pallas import tpu as pltpu


def _layer_norm(v, a, b, eps=1e-6):
    # torch .std() default is unbiased (divide by N-1); eps is added to std.
    mean = jnp.mean(v, axis=-1, keepdims=True)
    var = jnp.sum((v - mean) ** 2, axis=-1, keepdims=True) / (v.shape[-1] - 1)
    inv = pl.reciprocal(jnp.sqrt(var) + eps, approx=True)   # EUP, off the VALU
    return a * (v - mean) * inv + b


# --------------- kernel A: LN1 + fused QKV (head-major output) ---------------
def qkv_kernel(x_ref, wqkv_ref, bqkv_ref, ln_a_ref, ln_b_ref, qkv_ref):
    x = x_ref[0]                                        # (tq, D) f32
    xn = _layer_norm(x, ln_a_ref[...], ln_b_ref[...])
    y = jnp.dot(xn.astype(jnp.bfloat16), wqkv_ref[...],
                preferred_element_type=jnp.float32) + bqkv_ref[...]   # (tq, 3D)
    y = y.astype(qkv_ref.dtype)
    nh3, d_k = qkv_ref.shape[1], qkv_ref.shape[3]
    # On-chip head split: static lane slices -> head-major (3H, tq, d_k) output.
    for n in range(nh3):
        qkv_ref[0, n] = y[:, n * d_k:(n + 1) * d_k]


# --------------- kernel B: flash attention + out-proj + FFN -----------------
def attn_ffn_kernel(x_ref, q_ref, k_ref, v_ref, bias_ref,
                    wo_ref, bo_ref, ln2_a_ref, ln2_b_ref,
                    w1_ref, b1_ref, w2_ref, b2_ref,
                    out_ref, m_scr, l_scr, acc_scr):
    kv_i = pl.program_id(2)

    @pl.when(kv_i == 0)
    def _():
        m_scr[...] = jnp.full(m_scr.shape, -jnp.inf, m_scr.dtype)
        l_scr[...] = jnp.zeros(l_scr.shape, l_scr.dtype)
        acc_scr[...] = jnp.zeros(acc_scr.shape, acc_scr.dtype)

    q = q_ref[0]                                        # (H, tq,  dk) bf16 (pre-scaled)
    k = k_ref[0]                                        # (H, tkv, dk) bf16
    v = v_ref[0]                                        # (H, tkv, dk) bf16
    bias = bias_ref[0]                                  # (1, tkv)     f32 additive mask

    s = jnp.einsum("hqd,hkd->hqk", q, k,
                   preferred_element_type=jnp.float32)  # (H, tq, tkv)
    s = s + bias[None, :, :]

    m_prev = m_scr[...]
    m_new = jnp.maximum(m_prev, jnp.max(s, axis=-1, keepdims=True))
    alpha = jnp.exp(m_prev - m_new)
    # TODO(synk): on v6e/v7x a bf16 exp (p = jnp.exp((s - m_new).astype(jnp.bfloat16)))
    # roughly doubles EUP throughput; kept f32 so the same kernel is exact on v5e.
    p = jnp.exp(s - m_new)
    l_scr[...] = alpha * l_scr[...] + jnp.sum(p, axis=-1, keepdims=True)
    acc_scr[...] = alpha * acc_scr[...] + jnp.einsum(
        "hqk,hkd->hqd", p.astype(v.dtype), v,
        preferred_element_type=jnp.float32)
    m_scr[...] = m_new

    @pl.when(kv_i == pl.num_programs(2) - 1)
    def _():
        x = x_ref[0]                                    # (tq, D) f32
        attn_h = acc_scr[...] * pl.reciprocal(l_scr[...], approx=True)  # (H,tq,dk)
        nh = attn_h.shape[0]
        # Head merge: concat along features (cheap lane relayout), then ONE
        # full-K (tq,D)x(D,D) matmul so the MXU does the head reduction.
        merged = jnp.concatenate([attn_h[h] for h in range(nh)],
                                 axis=-1).astype(jnp.bfloat16)          # (tq, D)
        attn = jnp.dot(merged, wo_ref[...],
                       preferred_element_type=jnp.float32) + bo_ref[...]
        x1 = x + attn                                   # dropout(p=0) == identity

        x1n = _layer_norm(x1, ln2_a_ref[...], ln2_b_ref[...])
        h1 = jnp.dot(x1n.astype(jnp.bfloat16), w1_ref[...],
                     preferred_element_type=jnp.float32) + b1_ref[...]
        h1 = jnp.maximum(h1, 0.0)
        ff = jnp.dot(h1.astype(jnp.bfloat16), w2_ref[...],
                     preferred_element_type=jnp.float32) + b2_ref[...]
        # TODO(synk): if downstream layers accept bf16 activations, make this
        # output bf16 to halve the HBM writeback.
        out_ref[0] = (x1 + ff).astype(out_ref.dtype)


def _pick_tile(s, cap, align):
    """Largest multiple of `align` dividing `s`, <= cap; else s (no tiling)."""
    t = min(cap, s)
    t -= t % align
    while t >= align:
        if s % t == 0:
            return t
        t -= align
    return s


def _vmem_limit(block_bytes, scratch_bytes=0):
    """Explicit scoped-VMEM budget: blocks are double-buffered by default."""
    est = 2 * sum(block_bytes) + scratch_bytes
    est = int(est * 1.25) + (4 << 20)            # headroom for compiler temporaries
    return int(min(max(est, 32 << 20), 128 << 20))


def encoder_layer(x, mask, params, *, n_heads):
    B, S, D = x.shape
    d_k = D // n_heads
    d_ff = params["w1"].shape[1]
    scale = 1.0 / math.sqrt(d_k)

    # --- one-time weight prep: pack QKV, fold 1/sqrt(d_k) into Wq/bq, bf16 ---
    wqkv = jnp.concatenate(
        [params["wq"] * scale, params["wk"], params["wv"]], axis=1
    ).astype(jnp.bfloat16)                                        # (D, 3D)
    bqkv = jnp.concatenate(
        [params["bq"] * scale, params["bk"], params["bv"]], axis=1
    ).astype(jnp.float32)                                         # (1, 3D)
    wo = params["wo"].astype(jnp.bfloat16)                        # (D, D)
    w1 = params["w1"].astype(jnp.bfloat16)
    w2 = params["w2"].astype(jnp.bfloat16)

    # 128-aligned tiles (MXU M / lane dims); fall back to full S when S has no
    # 128-aligned divisor.
    tq = _pick_tile(S, 512, 128)     # query / row tile
    tkv = _pick_tile(S, 1024, 128)   # key/value tile (bias lane dim)
    n_q, n_kv = S // tq, S // tkv
    nh3 = 3 * n_heads

    # TODO(synk): on v7x (64 MiB VMEM) additionally mark the constant weight
    # BlockSpecs single-buffered (pipeline_mode=pl.Buffered(1)) or split the
    # FFN epilogue into its own pallas_call tiled over d_ff.

    # ------------------- kernel A: LayerNorm1 + fused QKV -------------------
    vmem_a = _vmem_limit(
        [tq * D * 4, D * 3 * D * 2, 3 * D * 4, D * 4, D * 4,
         nh3 * tq * d_k * 2])
    qkvh = pl.pallas_call(
        qkv_kernel,
        out_shape=jax.ShapeDtypeStruct((B, nh3, S, d_k), jnp.bfloat16),
        grid=(B, n_q),
        in_specs=[
            pl.BlockSpec((1, tq, D), lambda b, s: (b, s, 0)),
            pl.BlockSpec((D, 3 * D), lambda b, s: (0, 0)),
            pl.BlockSpec((1, 3 * D), lambda b, s: (0, 0)),
            pl.BlockSpec((1, D), lambda b, s: (0, 0)),
            pl.BlockSpec((1, D), lambda b, s: (0, 0)),
        ],
        out_specs=pl.BlockSpec((1, nh3, tq, d_k), lambda b, s: (b, 0, s, 0)),
        compiler_params=pltpu.CompilerParams(
            dimension_semantics=("parallel", "parallel"),
            vmem_limit_bytes=vmem_a),
    )(x, wqkv, bqkv, params["ln1_a"], params["ln1_b"])

    # Additive attention bias computed once (no per-step compare/select).
    bias = jnp.where(mask == 0, -1e9, 0.0).astype(jnp.float32)    # (B, 1, S)

    # -------- kernel B: flash attention + out-proj + residual + FFN ---------
    # TODO(synk): for heavily padded batches, prefetch per-batch valid lengths
    # (PrefetchScalarGridSpec) and skip fully-masked KV tiles with pl.when.
    vmem_b = _vmem_limit(
        [tq * D * 4,
         n_heads * tq * d_k * 2, n_heads * tkv * d_k * 2, n_heads * tkv * d_k * 2,
         tkv * 4,
         D * D * 2, D * 4, D * 4, D * 4,
         D * d_ff * 2, d_ff * 4, d_ff * D * 2, D * 4,
         tq * D * 4],
        scratch_bytes=n_heads * tq * (d_k + 2) * 4)
    out = pl.pallas_call(
        attn_ffn_kernel,
        out_shape=jax.ShapeDtypeStruct((B, S, D), jnp.float32),
        grid=(B, n_q, n_kv),
        in_specs=[
            pl.BlockSpec((1, tq, D), lambda b, qi, ki: (b, qi, 0)),               # x
            pl.BlockSpec((1, n_heads, tq, d_k), lambda b, qi, ki: (b, 0, qi, 0)),   # q heads
            pl.BlockSpec((1, n_heads, tkv, d_k), lambda b, qi, ki: (b, 1, ki, 0)),  # k heads
            pl.BlockSpec((1, n_heads, tkv, d_k), lambda b, qi, ki: (b, 2, ki, 0)),  # v heads
            pl.BlockSpec((1, 1, tkv), lambda b, qi, ki: (b, 0, ki)),              # bias
            pl.BlockSpec((D, D), lambda b, qi, ki: (0, 0)),                       # wo
            pl.BlockSpec((1, D), lambda b, qi, ki: (0, 0)),                       # bo
            pl.BlockSpec((1, D), lambda b, qi, ki: (0, 0)),                       # ln2_a
            pl.BlockSpec((1, D), lambda b, qi, ki: (0, 0)),                       # ln2_b
            pl.BlockSpec((D, d_ff), lambda b, qi, ki: (0, 0)),                    # w1
            pl.BlockSpec((1, d_ff), lambda b, qi, ki: (0, 0)),                    # b1
            pl.BlockSpec((d_ff, D), lambda b, qi, ki: (0, 0)),                    # w2
            pl.BlockSpec((1, D), lambda b, qi, ki: (0, 0)),                       # b2
        ],
        out_specs=pl.BlockSpec((1, tq, D), lambda b, qi, ki: (b, qi, 0)),
        scratch_shapes=[
            pltpu.VMEM((n_heads, tq, 1), jnp.float32),    # running max
            pltpu.VMEM((n_heads, tq, 1), jnp.float32),    # running denom
            pltpu.VMEM((n_heads, tq, d_k), jnp.float32),  # output accumulator
        ],
        compiler_params=pltpu.CompilerParams(
            dimension_semantics=("parallel", "parallel", "arbitrary"),
            vmem_limit_bytes=vmem_b),
    )(x, qkvh, qkvh, qkvh, bias, wo, params["bo"], params["ln2_a"], params["ln2_b"],
      w1, params["b1"], w2, params["b2"])
    return out


def encoder_layer_ref(x, mask, params, *, n_heads):
    """Pure-JAX f32 reference mirroring the PyTorch module (eval mode)."""
    B, S, D = x.shape
    d_k = D // n_heads

    def layer_norm(v, a, b, eps=1e-6):
        mean = jnp.mean(v, axis=-1, keepdims=True)
        var = jnp.sum((v - mean) ** 2, axis=-1, keepdims=True) / (D - 1)
        return a * (v - mean) / (jnp.sqrt(var) + eps) + b

    xn = layer_norm(x, params["ln1_a"], params["ln1_b"])
    q = xn @ params["wq"] + params["bq"]
    k = xn @ params["wk"] + params["bk"]
    v = xn @ params["wv"] + params["bv"]

    def split_heads(t):  # (B,S,D) -> (B,h,S,d_k)
        return t.reshape(B, S, n_heads, d_k).transpose(0, 2, 1, 3)

    qh, kh, vh = split_heads(q), split_heads(k), split_heads(v)
    scores = jnp.einsum("bhqd,bhkd->bhqk", qh, kh) / math.sqrt(d_k)
    m = mask[:, None, :, :]                                  # (B,1,1,S)
    scores = jnp.where(m == 0, -1e9, scores)
    p = jax.nn.softmax(scores, axis=-1)
    o = jnp.einsum("bhqk,bhkd->bhqd", p, vh)
    o = o.transpose(0, 2, 1, 3).reshape(B, S, D)
    attn = o @ params["wo"] + params["bo"]
    x1 = x + attn

    x1n = layer_norm(x1, params["ln2_a"], params["ln2_b"])
    ff = jnp.maximum(x1n @ params["w1"] + params["b1"], 0.0) @ params["w2"] + params["b2"]
    return x1 + ff


def init_params(key, d_model, d_ff):
    ks = jax.random.split(key, 8)
    s = 0.1
    return {
        "wq": jax.random.normal(ks[0], (d_model, d_model), jnp.float32) * s,
        "bq": jnp.zeros((1, d_model), jnp.float32),
        "wk": jax.random.normal(ks[1], (d_model, d_model), jnp.float32) * s,
        "bk": jnp.zeros((1, d_model), jnp.float32),
        "wv": jax.random.normal(ks[2], (d_model, d_model), jnp.float32) * s,
        "bv": jnp.zeros((1, d_model), jnp.float32),
        "wo": jax.random.normal(ks[3], (d_model, d_model), jnp.float32) * s,
        "bo": jax.random.normal(ks[4], (1, d_model), jnp.float32) * s,
        "ln1_a": jnp.ones((1, d_model), jnp.float32),
        "ln1_b": jnp.zeros((1, d_model), jnp.float32),
        "w1": jax.random.normal(ks[5], (d_model, d_ff), jnp.float32) * s,
        "b1": jax.random.normal(ks[6], (1, d_ff), jnp.float32) * s,
        "w2": jax.random.normal(ks[7], (d_ff, d_model), jnp.float32) * s,
        "b2": jnp.zeros((1, d_model), jnp.float32),
        "ln2_a": jnp.ones((1, d_model), jnp.float32),
        "ln2_b": jnp.zeros((1, d_model), jnp.float32),
    }


if __name__ == "__main__":
    B, S, D, H, DFF = 2, 8, 32, 4, 64
    key = jax.random.PRNGKey(0)
    kx, kp = jax.random.split(key)

    x = jax.random.normal(kx, (B, S, D), jnp.float32)
    # mask: [B, 1, S]; last two positions of batch 1 are padding
    mask = jnp.ones((B, 1, S), jnp.float32).at[1, 0, -2:].set(0.0)
    params = init_params(kp, D, DFF)

    out = encoder_layer(x, mask, params, n_heads=H)
    out = jax.block_until_ready(out)

    ref = encoder_layer_ref(x, mask, params, n_heads=H)
    assert out.shape == (B, S, D)
    assert bool(jnp.all(jnp.isfinite(out)))
    # bf16 MXU operands (f32 accumulation) + approx reciprocals -> loose tolerance
    assert bool(jnp.allclose(out, ref, atol=2e-2, rtol=2e-2))
    print("KERNEL_OK")
</pallas_src>

<mosaic_0001>
module attributes {stable_mosaic.version = 11 : i64} {
  func.func @qkv_kernel(%arg0: i32, %arg1: i32, %arg2: memref<1x8x32xf32, #tpu.memory_space<vmem>>, %arg3: memref<32x96xbf16, #tpu.memory_space<vmem>>, %arg4: memref<1x96xf32, #tpu.memory_space<vmem>>, %arg5: memref<1x32xf32, #tpu.memory_space<vmem>>, %arg6: memref<1x32xf32, #tpu.memory_space<vmem>>, %arg7: memref<1x12x8x8xbf16, #tpu.memory_space<vmem>>) attributes {dimension_semantics = [#tpu.dimension_semantics<parallel>, #tpu.dimension_semantics<parallel>], iteration_bounds = array<i64: 2, 1>, scalar_prefetch = 0 : i64, scratch_operands = 0 : i64, tpu.core_type = #tpu.core_type<tc>, window_params = [{transform_indices = @transform_0, window_bounds = array<i64: 1, 8, 32>}, {pipeline_mode = #tpu.pipeline_mode<synchronous>, transform_indices = @transform_1, window_bounds = array<i64: 32, 96>}, {pipeline_mode = #tpu.pipeline_mode<synchronous>, transform_indices = @transform_2, window_bounds = array<i64: 1, 96>}, {pipeline_mode = #tpu.pipeline_mode<synchronous>, transform_indices = @transform_3, window_bounds = array<i64: 1, 32>}, {pipeline_mode = #tpu.pipeline_mode<synchronous>, transform_indices = @transform_4, window_bounds = array<i64: 1, 32>}, {transform_indices = @transform_5, window_bounds = array<i64: 1, 12, 8, 8>}]} {
    %c0 = arith.constant 0 : index
    %c0_0 = arith.constant 0 : index
    %c0_1 = arith.constant 0 : index
    %0 = vector.load %arg2[%c0, %c0_0, %c0_1] : memref<1x8x32xf32, #tpu.memory_space<vmem>>, vector<1x8x32xf32>
    %1 = vector.shape_cast %0 : vector<1x8x32xf32> to vector<8x32xf32>
    %c0_2 = arith.constant 0 : index
    %c0_3 = arith.constant 0 : index
    %2 = vector.load %arg5[%c0_2, %c0_3] : memref<1x32xf32, #tpu.memory_space<vmem>>, vector<1x32xf32>
    %c0_4 = arith.constant 0 : index
    %c0_5 = arith.constant 0 : index
    %3 = vector.load %arg6[%c0_4, %c0_5] : memref<1x32xf32, #tpu.memory_space<vmem>>, vector<1x32xf32>
    %cst = arith.constant dense<0.000000e+00> : vector<8xf32>
    %4 = vector.multi_reduction <add>, %1, %cst [1] : vector<8x32xf32> to vector<8xf32>
    %5 = vector.shape_cast %4 : vector<8xf32> to vector<8x1xf32>
    %cst_6 = arith.constant 3.200000e+01 : f32
    %6 = vector.broadcast %cst_6 : f32 to vector<8x1xf32>
    %7 = arith.divf %5, %6 : vector<8x1xf32>
    %8 = vector.broadcast %7 : vector<8x1xf32> to vector<8x32xf32>
    %9 = arith.subf %1, %8 : vector<8x32xf32>
    %10 = arith.mulf %9, %9 : vector<8x32xf32>
    %cst_7 = arith.constant dense<0.000000e+00> : vector<8xf32>
    %11 = vector.multi_reduction <add>, %10, %cst_7 [1] : vector<8x32xf32> to vector<8xf32>
    %12 = vector.shape_cast %11 : vector<8xf32> to vector<8x1xf32>
    %cst_8 = arith.constant 3.100000e+01 : f32
    %13 = vector.broadcast %cst_8 : f32 to vector<8x1xf32>
    %14 = arith.divf %12, %13 : vector<8x1xf32>
    %15 = math.sqrt %14 : vector<8x1xf32>
    %cst_9 = arith.constant 9.99999997E-7 : f32
    %16 = vector.broadcast %cst_9 : f32 to vector<8x1xf32>
    %17 = arith.addf %15, %16 : vector<8x1xf32>
    %18 = tpu.reciprocal %17 {approx = true} : vector<8x1xf32> -> vector<8x1xf32>
    %19 = vector.broadcast %7 : vector<8x1xf32> to vector<8x32xf32>
    %20 = arith.subf %1, %19 : vector<8x32xf32>
    %21 = vector.broadcast %2 : vector<1x32xf32> to vector<8x32xf32>
    %22 = arith.mulf %21, %20 : vector<8x32xf32>
    %23 = vector.broadcast %18 : vector<8x1xf32> to vector<8x32xf32>
    %24 = arith.mulf %22, %23 : vector<8x32xf32>
    %25 = vector.broadcast %3 : vector<1x32xf32> to vector<8x32xf32>
    %26 = arith.addf %24, %25 : vector<8x32xf32>
    %27 = arith.truncf %26 : vector<8x32xf32> to vector<8x32xbf16>
    %c0_10 = arith.constant 0 : index
    %c0_11 = arith.constant 0 : index
    %28 = vector.load %arg3[%c0_10, %c0_11] : memref<32x96xbf16, #tpu.memory_space<vmem>>, vector<32x96xbf16>
    %cst_12 = arith.constant dense<0.000000e+00> : vector<8x96xf32>
    %29 = tpu.matmul %27, %28, %cst_12 {dimension_numbers = #tpu.dot_dimension_numbers<[1], [0], [0], [1], [0, 0, 1, 1], [], []>} : vector<8x32xbf16>, vector<32x96xbf16>, vector<8x96xf32> -> vector<8x96xf32>
    %c0_13 = arith.constant 0 : index
    %c0_14 = arith.constant 0 : index
    %30 = vector.load %arg4[%c0_13, %c0_14] : memref<1x96xf32, #tpu.memory_space<vmem>>, vector<1x96xf32>
    %31 = vector.broadcast %30 : vector<1x96xf32> to vector<8x96xf32>
    %32 = arith.addf %29, %31 : vector<8x96xf32>
    %33 = arith.truncf %32 : vector<8x96xf32> to vector<8x96xbf16>
    %34 = vector.extract_strided_slice %33 {offsets = [0, 0], sizes = [8, 8], strides = [1, 1]} : vector<8x96xbf16> to vector<8x8xbf16>
    %c0_15 = arith.constant 0 : index
    %c0_16 = arith.constant 0 : index
    %c0_17 = arith.constant 0 : index
    %c0_18 = arith.constant 0 : index
    %35 = vector.load %arg7[%c0_15, %c0_16, %c0_17, %c0_18] : memref<1x12x8x8xbf16, #tpu.memory_space<vmem>>, vector<1x1x8x8xbf16>
    %36 = vector.shape_cast %35 : vector<1x1x8x8xbf16> to vector<8x8xbf16>
    %37 = vector.shape_cast %34 : vector<8x8xbf16> to vector<1x1x8x8xbf16>
    tpu.vector_store %arg7[%c0_15, %c0_16, %c0_17, %c0_18], %37 {strides = array<i32>} : memref<1x12x8x8xbf16, #tpu.memory_space<vmem>>, vector<1x1x8x8xbf16>,
    %38 = vector.extract_strided_slice %33 {offsets = [0, 8], sizes = [8, 8], strides = [1, 1]} : vector<8x96xbf16> to vector<8x8xbf16>
    %c0_19 = arith.constant 0 : index
    %c1 = arith.constant 1 : index
    %c0_20 = arith.constant 0 : index
    %c0_21 = arith.constant 0 : index
    %39 = vector.load %arg7[%c0_19, %c1, %c0_20, %c0_21] : memref<1x12x8x8xbf16, #tpu.memory_space<vmem>>, vector<1x1x8x8xbf16>
    %40 = vector.shape_cast %39 : vector<1x1x8x8xbf16> to vector<8x8xbf16>
    %41 = vector.shape_cast %38 : vector<8x8xbf16> to vector<1x1x8x8xbf16>
    tpu.vector_store %arg7[%c0_19, %c1, %c0_20, %c0_21], %41 {strides = array<i32>} : memref<1x12x8x8xbf16, #tpu.memory_space<vmem>>, vector<1x1x8x8xbf16>,
    %42 = vector.extract_strided_slice %33 {offsets = [0, 16], sizes = [8, 8], strides = [1, 1]} : vector<8x96xbf16> to vector<8x8xbf16>
    %c0_22 = arith.constant 0 : index
    %c2 = arith.constant 2 : index
    %c0_23 = arith.constant 0 : index
    %c0_24 = arith.constant 0 : index
    %43 = vector.load %arg7[%c0_22, %c2, %c0_23, %c0_24] : memref<1x12x8x8xbf16, #tpu.memory_space<vmem>>, vector<1x1x8x8xbf16>
    %44 = vector.shape_cast %43 : vector<1x1x8x8xbf16> to vector<8x8xbf16>
    %45 = vector.shape_cast %42 : vector<8x8xbf16> to vector<1x1x8x8xbf16>
    tpu.vector_store %arg7[%c0_22, %c2, %c0_23, %c0_24], %45 {strides = array<i32>} : memref<1x12x8x8xbf16, #tpu.memory_space<vmem>>, vector<1x1x8x8xbf16>,
    %46 = vector.extract_strided_slice %33 {offsets = [0, 24], sizes = [8, 8], strides = [1, 1]} : vector<8x96xbf16> to vector<8x8xbf16>
    %c0_25 = arith.constant 0 : index
    %c3 = arith.constant 3 : index
    %c0_26 = arith.constant 0 : index
    %c0_27 = arith.constant 0 : index
    %47 = vector.load %arg7[%c0_25, %c3, %c0_26, %c0_27] : memref<1x12x8x8xbf16, #tpu.memory_space<vmem>>, vector<1x1x8x8xbf16>
    %48 = vector.shape_cast %47 : vector<1x1x8x8xbf16> to vector<8x8xbf16>
    %49 = vector.shape_cast %46 : vector<8x8xbf16> to vector<1x1x8x8xbf16>
    tpu.vector_store %arg7[%c0_25, %c3, %c0_26, %c0_27], %49 {strides = array<i32>} : memref<1x12x8x8xbf16, #tpu.memory_space<vmem>>, vector<1x1x8x8xbf16>,
    %50 = vector.extract_strided_slice %33 {offsets = [0, 32], sizes = [8, 8], strides = [1, 1]} : vector<8x96xbf16> to vector<8x8xbf16>
    %c0_28 = arith.constant 0 : index
    %c4 = arith.constant 4 : index
    %c0_29 = arith.constant 0 : index
    %c0_30 = arith.constant 0 : index
    %51 = vector.load %arg7[%c0_28, %c4, %c0_29, %c0_30] : memref<1x12x8x8xbf16, #tpu.memory_space<vmem>>, vector<1x1x8x8xbf16>
    %52 = vector.shape_cast %51 : vector<1x1x8x8xbf16> to vector<8x8xbf16>
    %53 = vector.shape_cast %50 : vector<8x8xbf16> to vector<1x1x8x8xbf16>
    tpu.vector_store %arg7[%c0_28, %c4, %c0_29, %c0_30], %53 {strides = array<i32>} : memref<1x12x8x8xbf16, #tpu.memory_space<vmem>>, vector<1x1x8x8xbf16>,
    %54 = vector.extract_strided_slice %33 {offsets = [0, 40], sizes = [8, 8], strides = [1, 1]} : vector<8x96xbf16> to vector<8x8xbf16>
    %c0_31 = arith.constant 0 : index
    %c5 = arith.constant 5 : index
    %c0_32 = arith.constant 0 : index
    %c0_33 = arith.constant 0 : index
    %55 = vector.load %arg7[%c0_31, %c5, %c0_32, %c0_33] : memref<1x12x8x8xbf16, #tpu.memory_space<vmem>>, vector<1x1x8x8xbf16>
    %56 = vector.shape_cast %55 : vector<1x1x8x8xbf16> to vector<8x8xbf16>
    %57 = vector.shape_cast %54 : vector<8x8xbf16> to vector<1x1x8x8xbf16>
    tpu.vector_store %arg7[%c0_31, %c5, %c0_32, %c0_33], %57 {strides = array<i32>} : memref<1x12x8x8xbf16, #tpu.memory_space<vmem>>, vector<1x1x8x8xbf16>,
    %58 = vector.extract_strided_slice %33 {offsets = [0, 48], sizes = [8, 8], strides = [1, 1]} : vector<8x96xbf16> to vector<8x8xbf16>
    %c0_34 = arith.constant 0 : index
    %c6 = arith.constant 6 : index
    %c0_35 = arith.constant 0 : index
    %c0_36 = arith.constant 0 : index
    %59 = vector.load %arg7[%c0_34, %c6, %c0_35, %c0_36] : memref<1x12x8x8xbf16, #tpu.memory_space<vmem>>, vector<1x1x8x8xbf16>
    %60 = vector.shape_cast %59 : vector<1x1x8x8xbf16> to vector<8x8xbf16>
    %61 = vector.shape_cast %58 : vector<8x8xbf16> to vector<1x1x8x8xbf16>
    tpu.vector_store %arg7[%c0_34, %c6, %c0_35, %c0_36], %61 {strides = array<i32>} : memref<1x12x8x8xbf16, #tpu.memory_space<vmem>>, vector<1x1x8x8xbf16>,
    %62 = vector.extract_strided_slice %33 {offsets = [0, 56], sizes = [8, 8], strides = [1, 1]} : vector<8x96xbf16> to vector<8x8xbf16>
    %c0_37 = arith.constant 0 : index
    %c7 = arith.constant 7 : index
    %c0_38 = arith.constant 0 : index
    %c0_39 = arith.constant 0 : index
    %63 = vector.load %arg7[%c0_37, %c7, %c0_38, %c0_39] : memref<1x12x8x8xbf16, #tpu.memory_space<vmem>>, vector<1x1x8x8xbf16>
    %64 = vector.shape_cast %63 : vector<1x1x8x8xbf16> to vector<8x8xbf16>
    %65 = vector.shape_cast %62 : vector<8x8xbf16> to vector<1x1x8x8xbf16>
    tpu.vector_store %arg7[%c0_37, %c7, %c0_38, %c0_39], %65 {strides = array<i32>} : memref<1x12x8x8xbf16, #tpu.memory_space<vmem>>, vector<1x1x8x8xbf16>,
    %66 = vector.extract_strided_slice %33 {offsets = [0, 64], sizes = [8, 8], strides = [1, 1]} : vector<8x96xbf16> to vector<8x8xbf16>
    %c0_40 = arith.constant 0 : index
    %c8 = arith.constant 8 : index
    %c0_41 = arith.constant 0 : index
    %c0_42 = arith.constant 0 : index
    %67 = vector.load %arg7[%c0_40, %c8, %c0_41, %c0_42] : memref<1x12x8x8xbf16, #tpu.memory_space<vmem>>, vector<1x1x8x8xbf16>
    %68 = vector.shape_cast %67 : vector<1x1x8x8xbf16> to vector<8x8xbf16>
    %69 = vector.shape_cast %66 : vector<8x8xbf16> to vector<1x1x8x8xbf16>
    tpu.vector_store %arg7[%c0_40, %c8, %c0_41, %c0_42], %69 {strides = array<i32>} : memref<1x12x8x8xbf16, #tpu.memory_space<vmem>>, vector<1x1x8x8xbf16>,
    %70 = vector.extract_strided_slice %33 {offsets = [0, 72], sizes = [8, 8], strides = [1, 1]} : vector<8x96xbf16> to vector<8x8xbf16>
    %c0_43 = arith.constant 0 : index
    %c9 = arith.constant 9 : index
    %c0_44 = arith.constant 0 : index
    %c0_45 = arith.constant 0 : index
    %71 = vector.load %arg7[%c0_43, %c9, %c0_44, %c0_45] : memref<1x12x8x8xbf16, #tpu.memory_space<vmem>>, vector<1x1x8x8xbf16>
    %72 = vector.shape_cast %71 : vector<1x1x8x8xbf16> to vector<8x8xbf16>
    %73 = vector.shape_cast %70 : vector<8x8xbf16> to vector<1x1x8x8xbf16>
    tpu.vector_store %arg7[%c0_43, %c9, %c0_44, %c0_45], %73 {strides = array<i32>} : memref<1x12x8x8xbf16, #tpu.memory_space<vmem>>, vector<1x1x8x8xbf16>,
    %74 = vector.extract_strided_slice %33 {offsets = [0, 80], sizes = [8, 8], strides = [1, 1]} : vector<8x96xbf16> to vector<8x8xbf16>
    %c0_46 = arith.constant 0 : index
    %c10 = arith.constant 10 : index
    %c0_47 = arith.constant 0 : index
    %c0_48 = arith.constant 0 : index
    %75 = vector.load %arg7[%c0_46, %c10, %c0_47, %c0_48] : memref<1x12x8x8xbf16, #tpu.memory_space<vmem>>, vector<1x1x8x8xbf16>
    %76 = vector.shape_cast %75 : vector<1x1x8x8xbf16> to vector<8x8xbf16>
    %77 = vector.shape_cast %74 : vector<8x8xbf16> to vector<1x1x8x8xbf16>
    tpu.vector_store %arg7[%c0_46, %c10, %c0_47, %c0_48], %77 {strides = array<i32>} : memref<1x12x8x8xbf16, #tpu.memory_space<vmem>>, vector<1x1x8x8xbf16>,
    %78 = vector.extract_strided_slice %33 {offsets = [0, 88], sizes = [8, 8], strides = [1, 1]} : vector<8x96xbf16> to vector<8x8xbf16>
    %c0_49 = arith.constant 0 : index
    %c11 = arith.constant 11 : index
    %c0_50 = arith.constant 0 : index
    %c0_51 = arith.constant 0 : index
    %79 = vector.load %arg7[%c0_49, %c11, %c0_50, %c0_51] : memref<1x12x8x8xbf16, #tpu.memory_space<vmem>>, vector<1x1x8x8xbf16>
    %80 = vector.shape_cast %79 : vector<1x1x8x8xbf16> to vector<8x8xbf16>
    %81 = vector.shape_cast %78 : vector<8x8xbf16> to vector<1x1x8x8xbf16>
    tpu.vector_store %arg7[%c0_49, %c11, %c0_50, %c0_51], %81 {strides = array<i32>} : memref<1x12x8x8xbf16, #tpu.memory_space<vmem>>, vector<1x1x8x8xbf16>,
    return
  }
  func.func @transform_0(%arg0: i32, %arg1: i32) -> (i32, i32, i32) {
    %c0_i32 = arith.constant 0 : i32
    %c0_i32_0 = arith.constant 0 : i32
    return %arg0, %arg1, %c0_i32 : i32, i32, i32
  }
  func.func @transform_1(%arg0: i32, %arg1: i32) -> (i32, i32) {
    %c0_i32 = arith.constant 0 : i32
    %c0_i32_0 = arith.constant 0 : i32
    %c0_i32_1 = arith.constant 0 : i32
    return %c0_i32, %c0_i32_0 : i32, i32
  }
  func.func @transform_2(%arg0: i32, %arg1: i32) -> (i32, i32) {
    %c0_i32 = arith.constant 0 : i32
    %c0_i32_0 = arith.constant 0 : i32
    %c0_i32_1 = arith.constant 0 : i32
    return %c0_i32, %c0_i32_0 : i32, i32
  }
  func.func @transform_3(%arg0: i32, %arg1: i32) -> (i32, i32) {
    %c0_i32 = arith.constant 0 : i32
    %c0_i32_0 = arith.constant 0 : i32
    %c0_i32_1 = arith.constant 0 : i32
    return %c0_i32, %c0_i32_0 : i32, i32
  }
  func.func @transform_4(%arg0: i32, %arg1: i32) -> (i32, i32) {
    %c0_i32 = arith.constant 0 : i32
    %c0_i32_0 = arith.constant 0 : i32
    %c0_i32_1 = arith.constant 0 : i32
    return %c0_i32, %c0_i32_0 : i32, i32
  }
  func.func @transform_5(%arg0: i32, %arg1: i32) -> (i32, i32, i32, i32) {
    %c0_i32 = arith.constant 0 : i32
    %c0_i32_0 = arith.constant 0 : i32
    %c0_i32_1 = arith.constant 0 : i32
    return %arg0, %c0_i32, %arg1, %c0_i32_0 : i32, i32, i32, i32
  }
}

</mosaic_0001>

<bundles_post_ra>
// kernel: tpu_custom_call.1
= control target key start
LH: loop header
LB: loop body
LE: loop exit
PB: predicated region body
PF: predicated region fallthrough
CT: control target
= control target key end

     0   :  { %10 = vsyncpa [#allocation3], 0  ;;  %s974_s0 = inlined_call_operand.hbm [shape: f32[2,8,32], index: 0, kind: input, shape index: {}]   ;;  %s975_s1 = inlined_call_operand.hbm [shape: bf16[32,96], index: 1, kind: input, shape index: {}]   ;;  %s976_s2 = inlined_call_operand.vmem [shape: f32[1,96], index: 2, kind: input, shape index: {}]   ;;  %s977_s3 = inlined_call_operand.vmem [shape: f32[1,32], index: 3, kind: input, shape index: {}]   ;;  %s978_s4 = inlined_call_operand.vmem [shape: f32[1,32], index: 4, kind: input, shape index: {}]   ;;  %s979_s5 = inlined_call_operand.vmem [shape: bf16[2,12,8,8], index: 5, kind: output, shape index: {}]  }
   0x1   :  { %12 = vsyncpa [#allocation3 + $0x1], 0 }
   0x2   :  { %13 = vsyncpa [#allocation5], 0  ;;  %s822_s18 = smov 0   ;;  %s824_s19 = smov 0  }
   0x3   :  { %s826_s20 = smov 0   ;;  %s828_s21 = smov 0  }
   0x4   :  { %s830_s22 = smov 0   ;;  %s832_s23 = smov 0  }
   0x5 LB: > { %s532_s24 = sadd.s32 4294967295, %s774_s23   ;;  %p534_p0 = scmp.ge.s32.totalorder %s774_s23, 1  ;;  %s774_s23 = sphi %s832_s23, %s19_s23   ;;  %s770_s22 = sphi %s830_s22, %s988_s22   ;;  %s766_s21 = sphi %s828_s21, %s987_s21   ;;  %s762_s20 = sphi %s826_s20, %s986_s20   ;;  %s758_s19 = sphi %s824_s19, %s985_s19   ;;  %s754_s18 = sphi %s822_s18, %s984_s18  }
   0x6   : > { %p854_p1 = scmp.eq.s32.totalorder %s532_s24, 0  ;;  %p176_p2 = scmp.lt.s32.totalorder %s774_s23, 3 }
   0x7   : > { %s187_s28 = sshll.u32 %s975_s1, 4  ;;  %s776_s30 = smov [#allocation4]   ;;  %s188_s28 = int_to_ptr.hbm [resolvable:$true] %s187_s28 }
   0x8   : > { %p862_p3 = pnand %p534_p0, %p176_p2  ;;  %s189_s6 = sshll.u32 %s776_s30, 4  ;;  %s190_s6 = int_to_ptr.vmem [resolvable:$true] %s189_s6 }
   0x9   : > { %s777_s7 = smov 64   ;;  %s778_s8 = smov 4  }
   0xa   : > { %p574_p4 = pneg %p862_p3  ;;  %s31_s9 = sadd.s32 1, %s770_s22 }
   0xb   : > { %p33_p6 = scmp.ge.s32.totalorder %s31_s9, 2  ;;  %p47_p7 = scmp.ne.s32.totalorder %s762_s20, %s758_s19 }
   0xc   : > { %p575_p5 = pnand %p574_p4, %p854_p1  ;;  %p48_p8 = scmp.eq.s32.totalorder %s774_s23, 0 }
   0xd   : > { %s990_s9 = smov (%p33_p6, %s31_s9), 0  ;;  %s40_s10 = sadd.s32 1, %s762_s20 }
   0xe   : > { %577 = dma.hbm_to_vmem [thread:$0]  (!%p575_p5), %s188_s28, 256, %s190_s6, [#allocation5], %s777_s7, %s777_s7, %s778_s8  }
   0xf   : > { %p53_p9 = scmp.ne.s32.totalorder %s758_s19, %s754_s18  ;;  %s35_s11 = ssub.s32 %s770_s22, %s990_s9 }
  0x10   : > { %p881_p10 = por %p48_p8, %p47_p7  ;;  %p38_p11 = scmp.eq.s32.totalorder %s35_s11, 0 }
  0x11   : > { %p887_p12 = por %p854_p1, %p53_p9  ;;  %s212_s14 = sand.u32 1, %s762_s20  }
  0x12   : > { %s538_s15 = sshll.u32 %s770_s22, 3  ;;  %p583_p13 = scmp.lt.s32.totalorder %s774_s23, 2 }
  0x13   : > { %s894_s16 = scalar_select %p38_p11, %s762_s20, %s40_s10  }
  0x14   : > { %s537_s17 = sshll.u32 %s212_s14, 3  ;;  %s221_s26 = scalar_lea.hbm %s974_s0, %s538_s15 }
  0x15   : > { %s223_s27 = sshll.u32 %s221_s26, 4  ;;  %s216_s28 = scalar_lea.vmem [#allocation2], %s537_s17  ;;  %s224_s27 = int_to_ptr.hbm [resolvable:$true] %s223_s27 }
  0x16   : > { %s225_s30 = sshll.u32 %s216_s28, 4  ;;  %p579_p0 = pnand %p583_p13, %p881_p10  ;;  %s226_s30 = int_to_ptr.vmem [resolvable:$true] %s225_s30 }
  0x17   : > { %s213_s6 = scalar_lea.sflag [#allocation3], %s212_s14  ;;  %234 = sbr.rel (%p862_p3) target bundleno = 589 (0x24d), region = 40 }
  0x18   : > { %581 = dma.hbm_to_vmem [thread:$0]  (!%p579_p0), %s224_s27, 128, %s226_s30, %s213_s6  }
  0x19   : > { %s236_s7 = sand.u32 (!%p862_p3), 1, %s758_s19  }
  0x1a   : > { %s540_s8 = sshll.u32 (!%p862_p3), %s236_s7, 3  ;;  %s237_s10 = scalar_lea.sflag (!%p862_p3), [#allocation3], %s236_s7 }
  0x1b   : > { %s240_s11 = scalar_lea.vmem (!%p862_p3), [#allocation2], %s540_s8 }
  0x1c   : > { %745 = dma.done.wait (%p887_p12), %s237_s10, 128  }
  0x1d   : > { %747 = vsyncadd (%p887_p12), %s237_s10, 4294967168 }
  0x1e   : > { %749 = dma.done.wait (%p854_p1), [#allocation5], 256  }
  0x1f   : > { %751 = vsyncadd (%p854_p1), [#allocation5], 4294967040  ;;  %vm288_vm0 = vcmask 261120   ;;  %v285_v0 = vld [vmem:[%s240_s11] sm:$0xff]  ;;  %v779_v2 = vmov 32.0   ;;  %v780_v14 = vmov 31.0  }
  0x20   : > { %v289_v1 = vsel %vm288_vm0, %v285_v0, 0.0  ;;  %652 = vrcp.f32 %v779_v2  ;;  %v566_v15 = vld [vmem:[#allocation4 + $0x8] sm:$0xff]  ;;  %v565_v17 = vld [vmem:[#allocation4] sm:$0xff]  ;;  %v649_v36 = vld [vmem:[%s977_s3] ss:$0 sm:$0xff]  ;;  %p276_p1 = scmp.lt.s32.totalorder %s766_s21, 1 }
  0x21   : > { %290 = vadd.xlane.f32.xlu0 %v289_v1  ;;  %654 = vrcp.f32 %v780_v14  ;;  %366 = vmatpush.bf16.msra.mxu0 %v566_v15  ;;  %v650_v38 = vld [vmem:[%s978_s4] ss:$0 sm:$0xff]  ;;  %vm374_vm5 = vcmask 60416   ;;  %s781_s27 = smov 88   ;;  %s782_s28 = smov 104  }
  0x22   : > { %s992_s21 = smov (!%p276_p1, %s766_s21), 1  ;;  %v651_v43 = vld [vmem:[%s976_s2] ss:$0 sm:$0xff]  ;;  %s783_s30 = smov 120  }
  0x23   : > { %s567_s17 = smul.u32 48, %s992_s21  ;;  %s784_s21 = smov 96  }
  0x24   : > { %s785_s6 = smov 112   ;;  %s786_s7 = smov 72  }
  0x25   : > { %367 = vmatpush.bf16.msra.mxu0 %v565_v17  ;;  %s930_s26 = scalar_lea.vmem %s979_s5, %s567_s17  ;;  %s787_s8 = smov 80  }
  0x26   : > { %v653_v3 = vpop.eup %652  ;;  %s788_s10 = smov 56   ;;  %s789_s11 = smov 64  }
  0x27   : > { %v293_v4 = vmul.f32 32.0, %v653_v3  ;;  %vm297_vm1 = vweird.f32 %v653_v3  ;;  %v655_v16 = vpop.eup %654  ;;  %s790_s25 = smov 40   ;;  %s791_s29 = smov 48  }
  0x28   : > { %v306_v18 = vmul.f32 31.0, %v655_v16  ;;  %vm310_vm2 = vweird.f32 %v655_v16 }
  0x29   : > { %v294_v5 = vsub.f32 1.0, %v293_v4 }
  0x2a   : > { %v307_v19 = vsub.f32 1.0, %v306_v18 }
  0x2b   : > { %v295_v6 = vmul.f32 %v653_v3, %v294_v5 }
  0x2c   : > { %v308_v20 = vmul.f32 %v655_v16, %v307_v19 }
  0x2d   : > { %v296_v7 = vadd.f32 %v653_v3, %v295_v6 }
  0x2e   : > { %v309_v21 = vadd.f32 %v655_v16, %v308_v20 }
  0x2f   : > { %v298_v8 = vsel %vm297_vm1, %v653_v3, %v296_v7 }
  0x30   : > { %v311_v22 = vsel %vm310_vm2, %v655_v16, %v309_v21 }
  0x94   : > { %v291_v9 = vpop.xlane.xlu0 %290 }
  0x95   : > { %v299_v10 = vmul.f32 %v298_v8, %v291_v9 }
  0x97   : > { %v300_v11 = vsub.f32 %v285_v0, %v299_v10 }
  0x99   : > { %v301_v12 = vmul.f32 %v300_v11, %v300_v11  ;;  %v330_v37 = vmul.f32 %v649_v36, %v300_v11 }
  0x9b   : > { %v302_v13 = vsel %vm288_vm0, %v301_v12, 0.0 }
  0x9c   : > { %303 = vadd.xlane.f32.xlu0 %v302_v13 }
 0x10f   : > { %v304_v23 = vpop.xlane.xlu0 %303 }
 0x110   : > { %v312_v24 = vmul.f32 %v311_v22, %v304_v23 }
 0x112   : > { %656 = vrsqrt.f32 %v312_v24  ;;  %vm320_vm3 = vcmp.eq.f32.partialorder %v312_v24, inf  ;;  %v323_v32 = vand.u32 2147483648, %v312_v24  ;;  %vm322_vm4 = vcmp.eq.f32.partialorder %v312_v24, 0.0 }
 0x118   : > { %v657_v25 = vpop.eup %656 }
 0x119   : > { %v314_v26 = vmul.f32 %v657_v25, %v312_v24 }
 0x11b   : > { %v315_v27 = vmul.f32 %v657_v25, %v314_v26 }
 0x11d   : > { %v316_v28 = vmul.f32 0.5, %v315_v27 }
 0x11f   : > { %v317_v29 = vsub.f32 1.5, %v316_v28 }
 0x121   : > { %v318_v30 = vmul.f32 %v657_v25, %v317_v29 }
 0x123   : > { %v319_v31 = vmul.f32 %v318_v30, %v312_v24 }
 0x125   : > { %v321_v33 = vsel %vm320_vm3, %v312_v24, %v319_v31 }
 0x126   : > { %v324_v34 = vsel %vm322_vm4, %v323_v32, %v321_v33 }
 0x127   : > { %v325_v35 = vadd.f32 1e-06, %v324_v34 }
 0x129   : > { %658 = vrcp.f32 %v325_v35 }
 0x12f   : > { %v659_v39 = vpop.eup %658 }
 0x130   : > { %v331_v40 = vmul.f32 %v659_v39, %v330_v37 }
 0x132   : > { %v335_v41 = vadd.f32 %v650_v38, %v331_v40 }
 0x134   : > { %v336_v42 = vpack.c.bf16 %v335_v41, %v335_v41 }
 0x136   : > { %551 = vmatmul.msk.bf16.vlgmr.msra.gmra.mxu0 %vm288_vm0, %v336_v42 }
 0x1b3   : > { %v369_v44 = vpop.f32.mrf.mxu0 }
 0x1b4   : > { %v370_v45 = vadd.f32 %v651_v43, %v369_v44 }
 0x1b6   : > { %v373_v46 = vpack.c.bf16 %v370_v45, %v370_v45 }
 0x1b8   : > { %397 = vrot.lane.b32.xlu0 %v373_v46, %s781_s27  ;;  %387 = vrot.lane.b32.xlu2 %v373_v46, %s782_s28  ;;  %375 = vst.msk [vmem:[%s930_s26] sm:$0xf] %vm374_vm5, %v373_v46 }
 0x1b9   : > { %377 = vrot.lane.b32.xlu1 %v373_v46, %s783_s30 }
 0x1bb   : > { %v371_v47 = vpop.f32.mrf.mxu0 }
 0x1c0   : > { %392 = vrot.lane.b32.xlu2 %v373_v46, %s784_s21 }
 0x1c1   : > { %382 = vrot.lane.b32.xlu1 %v373_v46, %s785_s6 }
 0x1c8   : > { %407 = vrot.lane.b32.xlu2 %v373_v46, %s786_s7 }
 0x1c9   : > { %402 = vrot.lane.b32.xlu1 %v373_v46, %s787_s8 }
 0x1d0   : > { %417 = vrot.lane.b32.xlu2 %v373_v46, %s788_s10 }
 0x1d1   : > { %412 = vrot.lane.b32.xlu1 %v373_v46, %s789_s11 }
 0x1d8   : > { %427 = vrot.lane.b32.xlu2 %v373_v46, %s790_s25 }
 0x1d9   : > { %422 = vrot.lane.b32.xlu1 %v373_v46, %s791_s29 }
 0x212   : > { %v388_v48 = vpop.permute.xlu2 %387 }
 0x213   : > { %554 = vst.msk [vmem:[%s930_s26 + $0xc] sm:$0xf] %vm374_vm5, %v388_v48 }
 0x21a   : > { %v393_v49 = vpop.permute.xlu2 %392 }
 0x21b   : > { %555 = vst.msk [vmem:[%s930_s26 + $0x10] sm:$0xf] %vm374_vm5, %v393_v49 }
 0x222   : > { %v408_v50 = vpop.permute.xlu2 %407 }
 0x223   : > { %558 = vst.msk [vmem:[%s930_s26 + $0x1c] sm:$0xf] %vm374_vm5, %v408_v50 }
 0x22a   : > { %v398_v51 = vpop.permute.xlu0 %397  ;;  %v418_v52 = vpop.permute.xlu2 %417 }
 0x22b   : > { %556 = vst.msk [vmem:[%s930_s26 + $0x14] sm:$0xf] %vm374_vm5, %v398_v51  ;;  %v378_v53 = vpop.permute.xlu1 %377 }
 0x22c   : > { %560 = vst.msk [vmem:[%s930_s26 + $0x24] sm:$0xf] %vm374_vm5, %v418_v52 }
 0x22d   : > { %552 = vst.msk [vmem:[%s930_s26 + $0x4] sm:$0xf] %vm374_vm5, %v378_v53 }
 0x232   : > { %v428_v54 = vpop.permute.xlu2 %427 }
 0x233   : > { %562 = vst.msk [vmem:[%s930_s26 + $0x2c] sm:$0xf] %vm374_vm5, %v428_v54  ;;  %v383_v55 = vpop.permute.xlu1 %382 }
 0x234   : > { %553 = vst.msk [vmem:[%s930_s26 + $0x8] sm:$0xf] %vm374_vm5, %v383_v55 }
 0x23b   : > { %v403_v56 = vpop.permute.xlu1 %402 }
 0x23c   : > { %557 = vst.msk [vmem:[%s930_s26 + $0x18] sm:$0xf] %vm374_vm5, %v403_v56 }
 0x243   : > { %v413_v57 = vpop.permute.xlu1 %412 }
 0x244   : > { %559 = vst.msk [vmem:[%s930_s26 + $0x20] sm:$0xf] %vm374_vm5, %v413_v57 }
 0x24b   : > { %v423_v58 = vpop.permute.xlu1 %422 }
 0x24c   : > { %561 = vst.msk [vmem:[%s930_s26 + $0x28] sm:$0xf] %vm374_vm5, %v423_v58 }
 0x24d PF: > { %s19_s23 = sadd.s32 1, %s774_s23   ;;  %s984_s18 = smov %s758_s19 }
 0x24e   : > { %p16_p2 = scmp.ge.s32.totalorder %s19_s23, 4   ;;  %s985_s19 = smov %s762_s20 }
 0x24f   : > { %s986_s20 = smov %s894_s16  ;;  %s987_s21 = smov %s770_s22 }
 0x250   : > { %s988_s22 = smov %s990_s9  ;;  %18 = sbr.rel (!%p16_p2) target bundleno = 5 (0x5), region = 95 }
 0x255   :  { %459 = vsyncpa [#allocation3], 1 }
 0x256   :  { %461 = vsyncpa [#allocation3 + $0x1], 1 }
 0x257   :  { %462 = vsyncpa [#allocation5], 1 }

</bundles_post_ra>
